<compile_context>
chip_gen: v6e
topology: v6e:2x2x1
jax: 0.10.0
libtpu: 0.0.40
codegen_flags: <defaults>
</compile_context>

<pallas_src>
import functools

import jax
import jax.numpy as jnp
from jax.experimental import pallas as pl
from jax.experimental.pallas import tpu as pltpu

_EPS = 1e-6  # torch.nn.PairwiseDistance default eps (added to the difference)


def _round_down(x, m):
    return (x // m) * m


def _round_up(x, m):
    return ((x + m - 1) // m) * m


def _sublane_align(itemsize):
    # Minimum sublane (second-to-last axis) tiling per dtype width.
    return {4: 8, 2: 16, 1: 32}.get(int(itemsize), 8)


def _vmem_capacity_bytes():
    try:
        info = pltpu.get_tpu_info()
        cap = getattr(info, "vmem_capacity_bytes", None)
        if cap:
            return int(cap)
    except Exception:
        pass
    return 64 << 20  # conservative fallback: v7x per-TC physical VMEM


def _triplet_hinge_kernel(a_ref, p_ref, n_ref, o_ref, *,
                          margin, batch, tile_b, mask_tail):
    """Per-sample hinge for one batch tile: max(d_ap - d_an + margin, 0).

    Inputs are (tile_b, D) blocks in the natural row layout; the reduction
    runs over the lane (feature) axis. Padded tail rows (when B % tile_b != 0)
    are zeroed here so the wrapper can sum without slicing.
    """
    a = a_ref[...].astype(jnp.float32)
    p = p_ref[...].astype(jnp.float32)
    n = n_ref[...].astype(jnp.float32)

    d_ap = jnp.sqrt(jnp.sum((a - p + _EPS) ** 2, axis=1, keepdims=True))
    d_an = jnp.sqrt(jnp.sum((a - n + _EPS) ** 2, axis=1, keepdims=True))
    hinge = jnp.maximum(d_ap - d_an + margin, 0.0)            # (tile_b, 1) f32

    if mask_tail:
        row = (pl.program_id(0) * tile_b
               + jax.lax.broadcasted_iota(jnp.int32, hinge.shape, 0))
        hinge = jnp.where(row < batch, hinge, 0.0)

    o_ref[...] = hinge


def triplet_loss(anchor, positive, negative, margin, *,
                 tile_b=None, target_grid_steps=8,
                 per_step_input_bytes=4 << 20):
    """mean(max(||a-p+eps|| - ||a-n+eps|| + margin, 0)).

    Note: `margin` must be a static Python number (it is baked into the
    kernel), matching the PyTorch module where margin is a constructor arg.
    """
    B, D = anchor.shape
    assert positive.shape == (B, D) and negative.shape == (B, D)
    assert positive.dtype == anchor.dtype and negative.dtype == anchor.dtype

    itemsize = jnp.dtype(anchor.dtype).itemsize
    align = _sublane_align(itemsize)

    # --- batch tile selection (dtype-aware, multi-step grid) -----------------
    # VMEM cap: 3 inputs, double-buffered, per_step_input_bytes per step.
    per_row_bytes = 3 * D * itemsize
    max_tile = max(align, _round_down(per_step_input_bytes // max(per_row_bytes, 1),
                                      align))
    if tile_b is None:
        if B <= align:
            tile_b = B                      # single full-array block, no padding
        else:
            # Aim for ~target_grid_steps independent steps so both v7x
            # TensorCores get work and the pipeline always overlaps.
            tile_from_steps = _round_up(pl.cdiv(B, target_grid_steps), align)
            tile_b = int(min(max_tile, tile_from_steps))
    else:
        tile_b = max(1, min(int(tile_b), B))
        if tile_b < B:                      # keep block batch dim HW-aligned
            tile_b = max(align, _round_down(tile_b, align))

    # Pad the batch to a multiple of the tile; padded rows are masked in-kernel.
    B_pad = _round_up(B, tile_b)
    a, p, n = anchor, positive, negative
    if B_pad != B:
        pad = ((0, B_pad - B), (0, 0))
        a = jnp.pad(a, pad)
        p = jnp.pad(p, pad)
        n = jnp.pad(n, pad)

    grid = (B_pad // tile_b,)
    mask_tail = B_pad != B

    # --- VMEM limit: derived from actual need, capped by chip capacity -------
    needed = 2 * (3 * tile_b * D * itemsize + tile_b * 4) + (2 << 20)
    ceiling = min(40 << 20, max(16 << 20, _vmem_capacity_bytes() // 2))
    vmem_limit = int(min(max(needed, 16 << 20), ceiling))

    kernel = functools.partial(
        _triplet_hinge_kernel,
        margin=float(margin), batch=B, tile_b=tile_b, mask_tail=mask_tail,
    )

    in_spec = pl.BlockSpec((tile_b, D), lambda i: (i, 0))
    hinge = pl.pallas_call(
        kernel,
        out_shape=jax.ShapeDtypeStruct((B_pad, 1), jnp.float32),
        grid=grid,
        in_specs=[in_spec, in_spec, in_spec],      # anchor, positive, negative
        out_specs=pl.BlockSpec((tile_b, 1), lambda i: (i, 0)),
        compiler_params=pltpu.CompilerParams(
            # Every tile is independent -> parallel axis (both TCs on v7x).
            dimension_semantics=("parallel",),
            vmem_limit_bytes=vmem_limit,
        ),
    )(a, p, n)

    # Padded rows are already zero; single sum + one divide in the wrapper.
    return jnp.sum(hinge) / B


def _reference(anchor, positive, negative, margin):
    d_ap = jnp.sqrt(jnp.sum((anchor - positive + _EPS) ** 2, axis=-1))
    d_an = jnp.sqrt(jnp.sum((anchor - negative + _EPS) ** 2, axis=-1))
    return jnp.mean(jnp.maximum(d_ap - d_an + margin, 0.0))


if __name__ == "__main__":
    key = jax.random.PRNGKey(0)
    k_a, k_p, k_n = jax.random.split(key, 3)

    B, D = 16, 32          # small demo shapes: 16 samples, 32-dim embeddings
    margin = 1.0           # TripletLoss(margin=1.0)

    anchor = jax.random.normal(k_a, (B, D), dtype=jnp.float32)
    positive = jax.random.normal(k_p, (B, D), dtype=jnp.float32)
    negative = jax.random.normal(k_n, (B, D), dtype=jnp.float32)

    loss = triplet_loss(anchor, positive, negative, margin)
    loss = jax.block_until_ready(loss)

    ref = _reference(anchor, positive, negative, margin)
    assert jnp.allclose(loss, ref, rtol=1e-5, atol=1e-5), (loss, ref)

    # Exercise the multi-tile + padded-tail path as well.
    B2 = 37
    a2 = jax.random.normal(k_a, (B2, D), dtype=jnp.float32)
    p2 = jax.random.normal(k_p, (B2, D), dtype=jnp.float32)
    n2 = jax.random.normal(k_n, (B2, D), dtype=jnp.float32)
    loss2 = jax.block_until_ready(triplet_loss(a2, p2, n2, margin))
    ref2 = _reference(a2, p2, n2, margin)
    assert jnp.allclose(loss2, ref2, rtol=1e-5, atol=1e-5), (loss2, ref2)

    print("KERNEL_OK")
</pallas_src>

<mosaic_0001>
module attributes {stable_mosaic.version = 11 : i64} {
  func.func @_triplet_hinge_kernel(%arg0: i32, %arg1: memref<8x32xf32, #tpu.memory_space<vmem>>, %arg2: memref<8x32xf32, #tpu.memory_space<vmem>>, %arg3: memref<8x32xf32, #tpu.memory_space<vmem>>, %arg4: memref<8x1xf32, #tpu.memory_space<vmem>>) attributes {dimension_semantics = [#tpu.dimension_semantics<parallel>], iteration_bounds = array<i64: 2>, scalar_prefetch = 0 : i64, scratch_operands = 0 : i64, tpu.core_type = #tpu.core_type<tc>, window_params = [{transform_indices = @transform_0, window_bounds = array<i64: 8, 32>}, {transform_indices = @transform_1, window_bounds = array<i64: 8, 32>}, {transform_indices = @transform_2, window_bounds = array<i64: 8, 32>}, {transform_indices = @transform_3, window_bounds = array<i64: 8, 1>}]} {
    %c0 = arith.constant 0 : index
    %c0_0 = arith.constant 0 : index
    %0 = vector.load %arg1[%c0, %c0_0] : memref<8x32xf32, #tpu.memory_space<vmem>>, vector<8x32xf32>
    %c0_1 = arith.constant 0 : index
    %c0_2 = arith.constant 0 : index
    %1 = vector.load %arg2[%c0_1, %c0_2] : memref<8x32xf32, #tpu.memory_space<vmem>>, vector<8x32xf32>
    %c0_3 = arith.constant 0 : index
    %c0_4 = arith.constant 0 : index
    %2 = vector.load %arg3[%c0_3, %c0_4] : memref<8x32xf32, #tpu.memory_space<vmem>>, vector<8x32xf32>
    %3 = arith.subf %0, %1 : vector<8x32xf32>
    %cst = arith.constant 9.99999997E-7 : f32
    %4 = vector.broadcast %cst : f32 to vector<8x32xf32>
    %5 = arith.addf %3, %4 : vector<8x32xf32>
    %6 = arith.mulf %5, %5 : vector<8x32xf32>
    %cst_5 = arith.constant dense<0.000000e+00> : vector<8xf32>
    %7 = vector.multi_reduction <add>, %6, %cst_5 [1] : vector<8x32xf32> to vector<8xf32>
    %8 = vector.shape_cast %7 : vector<8xf32> to vector<8x1xf32>
    %9 = math.sqrt %8 : vector<8x1xf32>
    %10 = arith.subf %0, %2 : vector<8x32xf32>
    %cst_6 = arith.constant 9.99999997E-7 : f32
    %11 = vector.broadcast %cst_6 : f32 to vector<8x32xf32>
    %12 = arith.addf %10, %11 : vector<8x32xf32>
    %13 = arith.mulf %12, %12 : vector<8x32xf32>
    %cst_7 = arith.constant dense<0.000000e+00> : vector<8xf32>
    %14 = vector.multi_reduction <add>, %13, %cst_7 [1] : vector<8x32xf32> to vector<8xf32>
    %15 = vector.shape_cast %14 : vector<8xf32> to vector<8x1xf32>
    %16 = math.sqrt %15 : vector<8x1xf32>
    %17 = arith.subf %9, %16 : vector<8x1xf32>
    %cst_8 = arith.constant 1.000000e+00 : f32
    %18 = vector.broadcast %cst_8 : f32 to vector<8x1xf32>
    %19 = arith.addf %17, %18 : vector<8x1xf32>
    %cst_9 = arith.constant 0.000000e+00 : f32
    %20 = vector.broadcast %cst_9 : f32 to vector<8x1xf32>
    %21 = arith.maximumf %19, %20 : vector<8x1xf32>
    %c0_10 = arith.constant 0 : index
    %c0_11 = arith.constant 0 : index
    %22 = vector.load %arg4[%c0_10, %c0_11] : memref<8x1xf32, #tpu.memory_space<vmem>>, vector<8x1xf32>
    tpu.vector_store %arg4[%c0_10, %c0_11], %21 {strides = array<i32>} : memref<8x1xf32, #tpu.memory_space<vmem>>, vector<8x1xf32>,
    return
  }
  func.func @transform_0(%arg0: i32) -> (i32, i32) {
    %c0_i32 = arith.constant 0 : i32
    %c0_i32_0 = arith.constant 0 : i32
    return %arg0, %c0_i32 : i32, i32
  }
  func.func @transform_1(%arg0: i32) -> (i32, i32) {
    %c0_i32 = arith.constant 0 : i32
    %c0_i32_0 = arith.constant 0 : i32
    return %arg0, %c0_i32 : i32, i32
  }
  func.func @transform_2(%arg0: i32) -> (i32, i32) {
    %c0_i32 = arith.constant 0 : i32
    %c0_i32_0 = arith.constant 0 : i32
    return %arg0, %c0_i32 : i32, i32
  }
  func.func @transform_3(%arg0: i32) -> (i32, i32) {
    %c0_i32 = arith.constant 0 : i32
    %c0_i32_0 = arith.constant 0 : i32
    return %arg0, %c0_i32 : i32, i32
  }
}

</mosaic_0001>

<bundles_post_ra>
// kernel: tpu_custom_call.1
= control target key start
LH: loop header
LB: loop body
LE: loop exit
PB: predicated region body
PF: predicated region fallthrough
CT: control target
= control target key end

     0   :  { %8 = vsyncpa [#allocation3], 0  ;;  %s790_s0 = inlined_call_operand.hbm [shape: f32[16,32], index: 0, kind: input, shape index: {}]   ;;  %s791_s1 = inlined_call_operand.hbm [shape: f32[16,32], index: 1, kind: input, shape index: {}]   ;;  %s792_s2 = inlined_call_operand.hbm [shape: f32[16,32], index: 2, kind: input, shape index: {}]   ;;  %s793_s3 = inlined_call_operand.vmem [shape: f32[16,1], index: 3, kind: output, shape index: {}]  }
   0x1   :  { %10 = vsyncpa [#allocation3 + $0x1], 0 }
   0x2   :  { %11 = vsyncpa [#allocation5], 0 }
   0x3   :  { %13 = vsyncpa [#allocation5 + $0x1], 0  ;;  %s616_s12 = smov 0   ;;  %s618_s13 = smov 0  }
   0x4   :  { %s620_s14 = smov 0   ;;  %s622_s15 = smov 0  }
   0x5 LB: > { %s635_s16 = sadd.s32 4294967295, %s591_s15   ;;  %s638_s17 = sadd.s32 1, %s591_s15   ;;  %s591_s15 = sphi %s622_s15, %s806_s15   ;;  %s587_s14 = sphi %s620_s14, %s805_s14   ;;  %s583_s13 = sphi %s618_s13, %s804_s13   ;;  %s579_s12 = sphi %s616_s12, %s803_s12  }
   0x6   : > { %s23_s18 = ssub.s32 %s591_s15, %s638_s17  ;;  %s26_s19 = sadd.s32 1, %s587_s14 }
   0x7   : > { %p24_p0 = scmp.eq.s32.totalorder %s23_s18, 0  ;;  %p33_p1 = scmp.ne.s32.totalorder %s587_s14, %s583_s13 }
   0x8   : > { %p34_p2 = scmp.eq.s32.totalorder %s591_s15, 0  ;;  %p39_p3 = scmp.ne.s32.totalorder %s583_s13, %s579_s12 }
   0x9   : > { %s648_s20 = scalar_select %p24_p0, %s587_s14, %s26_s19  }
   0xa   : > { %p35_p4 = por %p34_p2, %p33_p1  ;;  %p40_p5 = scmp.eq.s32.totalorder %s635_s16, 0 }
   0xb   : > { %p432_p6 = scmp.lt.s32.totalorder %s591_s15, 2  ;;  %s141_s22 = sand.u32 1, %s587_s14  }
   0xc   : > { %p652_p7 = por %p40_p5, %p39_p3  ;;  %s659_s23 = sshll.u32 %s141_s22, 3 }
   0xd   : > { %s662_s24 = sshll.u32 %s591_s15, 7  ;;  %p664_p8 = pnand %p432_p6, %p35_p4 }
   0xe   : > { %s795_s21 = scalar_select %p652_p7, 1, 0 }
   0xf   : > { %s159_s26 = sand.u32 1, %s591_s15   ;;  %s673_s29 = scalar_lea.hbm %s791_s1, %s662_s24 }
  0x10   : > { %s163_s30 = scalar_lea.vmem [#allocation4], %s659_s23  ;;  %s678_s5 = scalar_lea.sflag [#allocation5], %s159_s26 }
  0x11   : > { %s170_s4 = sshll.u32 %s163_s30, 4  ;;  %s469_s6 = scalar_lea.hbm %s673_s29, 128  ;;  %s171_s4 = int_to_ptr.vmem [resolvable:$true] %s170_s4 }
  0x12   : > { %p470_p11 = scmp.ne.s32.totalorder %s673_s29, %s469_s6  ;;  %p684_p12 = pneg %p664_p8 }
  0x13   : > { %s474_s10 = scalar_lea.hbm %s791_s1, 256  ;;  %p475_p1 = scmp.lt.s32.totalorder %s673_s29, %s791_s1 }
  0x14   : > { %p472_p13 = pnand %p684_p12, %p470_p11  ;;  %p476_p2 = scmp.lt.s32.totalorder %s474_s10, %s469_s6 }
  0x16   : > { %p473_p0 = pneg %p472_p13  ;;  %p477_p3 = por %p476_p2, %p475_p1 }
  0x18   : > { %p478_p4 = pnand %p477_p3, %p473_p0 }
  0x1a   : > { %481 = shalt.err (!%p478_p4)
}
  0x1b   : > { %s482_s18 = scalar_lea.vmem %s171_s4, 128  ;;  %s593_s19 = smov [#allocation4]  }
  0x1c   : > { %p483_p5 = scmp.ne.s32.totalorder %s171_s4, %s482_s18  ;;  %s487_s26 = sshll.u32 %s593_s19, 4  ;;  %s488_s26 = int_to_ptr.vmem [resolvable:$false] %s487_s26 }
  0x1d   : > { %s489_s27 = scalar_lea.vmem %s488_s26, 256  ;;  %p490_p11 = scmp.lt.s32.totalorder %s171_s4, %s488_s26 }
  0x1e   : > { %p485_p6 = pnand %p483_p5, %p684_p12  ;;  %p491_p13 = scmp.lt.s32.totalorder %s489_s27, %s482_s18 }
  0x20   : > { %p486_p9 = pneg %p485_p6  ;;  %p492_p10 = por %p491_p13, %p490_p11 }
  0x22   : > { %p493_p7 = pnand %p492_p10, %p486_p9 }
  0x24   : > { %496 = shalt.err (!%p493_p7)
}
  0x25   : > { %428 = dma.hbm_to_vmem [thread:$0]  (!%p664_p8), %s673_s29, 128, %s171_s4, %s678_s5  }
  0x26   : > { %p798_p0 = scmp.lt.s32.totalorder %s591_s15, 3  ;;  %p799_p1 = scmp.ge.s32.totalorder %s591_s15, 1 }
  0x27   : > { %s715_s8 = scalar_lea.hbm %s790_s0, %s662_s24  ;;  %s145_s9 = scalar_lea.vmem [#allocation2], %s659_s23 }
  0x28   : > { %p707_p2 = pnand %p799_p1, %p798_p0  ;;  %s152_s10 = sshll.u32 %s145_s9, 4  ;;  %s153_s10 = int_to_ptr.vmem [resolvable:$true] %s152_s10 }
  0x29   : > { %s722_s29 = scalar_lea.hbm %s792_s2, %s662_s24  ;;  %s142_s15 = scalar_lea.sflag [#allocation3], %s141_s22 }
  0x2a   : > { %s800_s28 = scalar_select %p707_p2, 1, 0 }
  0x2b   : > { %s497_s4 = scalar_lea.hbm %s715_s8, 128  ;;  %s502_s26 = scalar_lea.hbm %s790_s0, 256 }
  0x2c   : > { %p498_p7 = scmp.ne.s32.totalorder %s715_s8, %s497_s4  ;;  %p503_p3 = scmp.lt.s32.totalorder %s715_s8, %s790_s0 }
  0x2d   : > { %p504_p4 = scmp.lt.s32.totalorder %s502_s26, %s497_s4 }
  0x2e   : > { %p500_p9 = pnand %p498_p7, %p684_p12 }
  0x2f   : > { %p505_p5 = por %p504_p4, %p503_p3 }
  0x30   : > { %p501_p10 = pneg %p500_p9 }
  0x32   : > { %p506_p6 = pnand %p505_p5, %p501_p10 }
  0x34   : > { %509 = shalt.err (!%p506_p6)
}
  0x35   : > { %s510_s24 = scalar_lea.vmem %s153_s10, 128  ;;  %s594_s22 = smov [#allocation2]  }
  0x36   : > { %p511_p11 = scmp.ne.s32.totalorder %s153_s10, %s510_s24  ;;  %s515_s6 = sshll.u32 %s594_s22, 4  ;;  %s516_s6 = int_to_ptr.vmem [resolvable:$false] %s515_s6 }
  0x37   : > { %s517_s9 = scalar_lea.vmem %s516_s6, 256  ;;  %p518_p1 = scmp.lt.s32.totalorder %s153_s10, %s516_s6 }
  0x38   : > { %p513_p13 = pnand %p511_p11, %p684_p12  ;;  %p519_p7 = scmp.lt.s32.totalorder %s517_s9, %s510_s24 }
  0x3a   : > { %p514_p0 = pneg %p513_p13  ;;  %p520_p9 = por %p519_p7, %p518_p1 }
  0x3c   : > { %p521_p2 = pnand %p520_p9, %p514_p0 }
  0x3e   : > { %524 = shalt.err (!%p521_p2)
}
  0x3f   : > { %425 = dma.hbm_to_vmem [thread:$0]  (!%p664_p8), %s715_s8, 128, %s153_s10, %s142_s15  }
  0x40   : > { %s181_s11 = scalar_lea.vmem [#allocation6], %s659_s23  ;;  %s525_s4 = scalar_lea.hbm %s722_s29, 128 }
  0x41   : > { %s188_s12 = sshll.u32 %s181_s11, 4  ;;  %p526_p10 = scmp.ne.s32.totalorder %s722_s29, %s525_s4  ;;  %s189_s12 = int_to_ptr.vmem [resolvable:$true] %s188_s12 }
  0x42   : > { %s530_s26 = scalar_lea.hbm %s792_s2, 256  ;;  %p531_p2 = scmp.lt.s32.totalorder %s722_s29, %s792_s2 }
  0x43   : > { %p528_p3 = pnand %p526_p10, %p684_p12  ;;  %p532_p5 = scmp.lt.s32.totalorder %s530_s26, %s525_s4 }
  0x45   : > { %p529_p4 = pneg %p528_p3  ;;  %p533_p6 = por %p532_p5, %p531_p2 }
  0x47   : > { %p534_p11 = pnand %p533_p6, %p529_p4 }
  0x49   : > { %537 = shalt.err (!%p534_p11)
}
  0x4a   : > { %s538_s23 = scalar_lea.vmem %s189_s12, 128  ;;  %s595_s8 = smov [#allocation6]  }
  0x4b   : > { %p539_p13 = scmp.ne.s32.totalorder %s189_s12, %s538_s23  ;;  %s543_s10 = sshll.u32 %s595_s8, 4  ;;  %s544_s10 = int_to_ptr.vmem [resolvable:$false] %s543_s10 }
  0x4c   : > { %s545_s15 = scalar_lea.vmem %s544_s10, 256  ;;  %p546_p7 = scmp.lt.s32.totalorder %s189_s12, %s544_s10 }
  0x4d   : > { %p541_p0 = pnand %p539_p13, %p684_p12  ;;  %p547_p9 = scmp.lt.s32.totalorder %s545_s15, %s538_s23 }
  0x4f   : > { %p542_p1 = pneg %p541_p0  ;;  %p548_p10 = por %p547_p9, %p546_p7 }
  0x51   : > { %p549_p3 = pnand %p548_p10, %p542_p1 }
  0x53   : > { %552 = shalt.err (!%p549_p3)
}
  0x54   : > { %431 = dma.hbm_to_vmem [thread:$0]  (!%p664_p8), %s722_s29, 128, %s189_s12, %s678_s5  }
  0x55   : > { %p801_p4 = scmp.ne.s32.totalorder %s800_s28, 0 }
  0x56   : > { %s199_s7 = sand.u32 (!%p801_p4), 1, %s583_s13   ;;  %p802_p12 = scmp.ne.s32.totalorder (!%p801_p4), %s795_s21, 0 }
  0x57   : > { %197 = sbr.rel (%p801_p4) target bundleno = 271 (0x10f), region = 32  ;;  %s410_s24 = sshll.u32 (!%p801_p4), %s199_s7, 3 }
  0x58   : > { %s200_s22 = scalar_lea.sflag (!%p801_p4), [#allocation3], %s199_s7  ;;  %s203_s6 = scalar_lea.vmem (!%p801_p4), [#allocation2], %s410_s24 }
  0x5c   : > { %570 = dma.done.wait (%p802_p12), %s200_s22, 128  }
  0x5d   : > { %572 = vsyncadd (%p802_p12), %s200_s22, 4294967168  ;;  %s208_s25 = sand.u32 1, %s635_s16   ;;  %s212_s11 = scalar_lea.vmem [#allocation4], %s410_s24 }
  0x5e   : > { %s209_s9 = scalar_lea.sflag [#allocation5], %s208_s25 }
  0x5f   : > { %574 = dma.done.wait (%p802_p12), %s209_s9, 256  }
  0x60   : > { %576 = vsyncadd (%p802_p12), %s209_s9, 4294967040  ;;  %v257_v0 = vld [vmem:[%s203_s6] sm:$0xff]  ;;  %v258_v1 = vld [vmem:[%s212_s11] sm:$0xff]  ;;  %s221_s5 = scalar_lea.vmem [#allocation6], %s410_s24  ;;  %vm263_vm0 = vcmask 261120   ;;  %p253_p8 = scmp.lt.s32.totalorder %s635_s16, 1 }
  0x61   : > { %v259_v2 = vld [vmem:[%s221_s5] sm:$0xff]  ;;  %v260_v3 = vsub.f32 %v257_v0, %v258_v1  ;;  %vm290_vm5 = vcmask 7168  }
  0x62   : > { %v274_v4 = vsub.f32 %v257_v0, %v259_v2  ;;  %s808_s16 = smov (!%p253_p8, %s635_s16), 1 }
  0x63   : > { %v261_v5 = vadd.f32 1e-06, %v260_v3  ;;  %s413_s21 = sshll.u32 %s808_s16, 3 }
  0x64   : > { %v275_v6 = vadd.f32 1e-06, %v274_v4  ;;  %s256_s12 = scalar_lea.vmem %s793_s3, %s413_s21 }
  0x65   : > { %v262_v7 = vmul.f32 %v261_v5, %v261_v5 }
  0x66   : > { %v276_v8 = vmul.f32 %v275_v6, %v275_v6 }
  0x67   : > { %v264_v9 = vsel %vm263_vm0, %v262_v7, 0.0 }
  0x68   : > { %265 = vadd.xlane.f32.xlu0 %v264_v9  ;;  %v277_v10 = vsel %vm263_vm0, %v276_v8, 0.0 }
  0x6c   : > { %278 = vadd.xlane.f32.xlu0 %v277_v10 }
  0xf1   : > { %v266_v11 = vpop.xlane.xlu0 %265 }
  0xf2   : > { %465 = vrsqrt.f32 %v266_v11  ;;  %vm269_vm1 = vcmp.eq.f32.partialorder %v266_v11, inf  ;;  %v272_v18 = vand.u32 2147483648, %v266_v11  ;;  %vm271_vm3 = vcmp.eq.f32.partialorder %v266_v11, 0.0 }
  0xf5   : > { %v279_v12 = vpop.xlane.xlu0 %278 }
  0xf6   : > { %467 = vrsqrt.f32 %v279_v12  ;;  %vm282_vm2 = vcmp.eq.f32.partialorder %v279_v12, inf  ;;  %v285_v19 = vand.u32 2147483648, %v279_v12  ;;  %vm284_vm4 = vcmp.eq.f32.partialorder %v279_v12, 0.0 }
  0xff   : > { %v466_v13 = vpop.eup %465 }
 0x100   : > { %v268_v14 = vmul.f32 %v466_v13, %v266_v11 }
 0x102   : > { %v270_v16 = vsel %vm269_vm1, %v266_v11, %v268_v14 }
 0x103   : > { %v468_v15 = vpop.eup %467  ;;  %v273_v21 = vsel %vm271_vm3, %v272_v18, %v270_v16 }
 0x104   : > { %v281_v17 = vmul.f32 %v468_v15, %v279_v12 }
 0x106   : > { %v283_v20 = vsel %vm282_vm2, %v279_v12, %v281_v17 }
 0x107   : > { %v286_v22 = vsel %vm284_vm4, %v285_v19, %v283_v20 }
 0x108   : > { %v287_v23 = vsub.f32 %v273_v21, %v286_v22 }
 0x10a   : > { %v288_v24 = vadd.f32 1.0, %v287_v23 }
 0x10c   : > { %v289_v25 = vmax.f32 %v288_v24, 0.0 }
 0x10e   : > { %291 = vst.msk [vmem:[%s256_s12] sm:$0xff] %vm290_vm5, %v289_v25 }
 0x10f PF: > { %p16_p2 = scmp.ge.s32.totalorder %s638_s17, 4   ;;  %s803_s12 = smov %s583_s13 }
 0x110   : > { %s804_s13 = smov %s587_s14  ;;  %s805_s14 = smov %s648_s20 }
 0x111   : > { %s806_s15 = smov %s638_s17  ;;  %18 = sbr.rel (!%p16_p2) target bundleno = 5 (0x5), region = 96 }
 0x116   :  { %311 = vsyncpa [#allocation3], 1 }
 0x117   :  { %313 = vsyncpa [#allocation3 + $0x1], 1 }
 0x118   :  { %314 = vsyncpa [#allocation5], 1 }
 0x119   :  { %316 = vsyncpa [#allocation5 + $0x1], 1 }

</bundles_post_ra>
